<compile_context>
chip_gen: v5e
topology: v5e:2x2
jax: 0.10.0
libtpu: 0.0.40
codegen_flags: <defaults>
</compile_context>

<pallas_src>
import functools
import math

import jax
import jax.numpy as jnp
from jax import lax
from jax.experimental import pallas as pl
from jax.experimental.pallas import tpu as pltpu


# ---------------------- generation-aware sizing helpers -----------------------
def _vmem_capacity_bytes():
    cap = 128 * 1024 * 1024
    try:
        info = pltpu.get_tpu_info()
        cap = int(getattr(info, "vmem_capacity_bytes", cap) or cap)
    except Exception:
        pass
    return cap


def _vmem_limit_bytes():
    # ~40 MiB on 64 MiB parts (v7x), ~83 MiB (capped at 96) on v5e/v6e.
    return int(min(_vmem_capacity_bytes() * 0.65, 96 * 1024 * 1024))


def _tile_prefs():
    if _vmem_capacity_bytes() >= 100 * 1024 * 1024:   # v5e / v6e (128 MiB VMEM)
        return 256, 512                               # (row-tile pref, d_ff-chunk pref)
    return 128, 256                                   # v7x (64 MiB VMEM)


def _seq_tile(s, pref):
    if s <= pref:
        return s
    t = pref
    while t > 8 and (s % t or t % 8):
        t -= 8
    return t if s % t == 0 else s


def _ff_tile(f, pref):
    if f <= pref:
        return f
    t = pref
    while t > 128 and (f % t or t % 128):
        t -= 128
    return t if (f % t == 0 and t % 128 == 0) else f


def _vocab_tile(v, pref=2048):
    if v <= pref:
        return v
    t = pref
    while t >= 128 and v % t:
        t -= 128
    return t if (t >= 128 and v % t == 0) else v


# ------------------------------ shared math -----------------------------------
def _layernorm(x, gamma, beta, eps=1e-5):
    mu = jnp.mean(x, axis=-1, keepdims=True)
    var = jnp.mean((x - mu) ** 2, axis=-1, keepdims=True)
    return (x - mu) * lax.rsqrt(var + eps) * gamma + beta


def _gelu_exact(x):
    # torch.nn.GELU() default (erf form) — kept exact for parity with the spec.
    return 0.5 * x * (1.0 + lax.erf(x * (1.0 / math.sqrt(2.0))))


# -------------------------- kernel 1: LN1 + fused QKV -------------------------
def ln1_qkv_kernel(x_ref, g_ref, b_ref, wqkv_ref, bqkv_ref, q_ref, k_ref, v_ref):
    d = x_ref.shape[-1]
    xn = _layernorm(x_ref[0], g_ref[0], b_ref[0]).astype(jnp.bfloat16)
    # Column-sliced dots: only one (TQ, D) f32 intermediate is ever live.
    for i, o_ref in enumerate((q_ref, k_ref, v_ref)):
        w = wqkv_ref[:, i * d:(i + 1) * d]
        o_ref[0] = (jnp.dot(xn, w, preferred_element_type=jnp.float32)
                    + bqkv_ref[0, i * d:(i + 1) * d]).astype(o_ref.dtype)


# ------ kernel 2: streamed-KV flash attention + Wo + LN2 + d_ff-tiled MLP -----
# Inner grid axis it:  it < n_kv  -> one online-softmax step on KV tile `it`
#                      it == n_kv -> finalize attention (Wo, residual, LN2)
#                      it >= n_kv -> MLP chunk (it - n_kv) accumulated
#                      it == last -> second residual, lane-dense (TQ, D) store
def attn_mlp_kernel(n_heads, d_key, n_kv,
                    x_ref, q_ref, k_ref, v_ref,
                    wo_ref, bo_ref, g2_ref, bt2_ref,
                    w1_ref, b1_ref, w2_ref, b2_ref,
                    out_ref,
                    qh_s, m_s, l_s, att_s, y1_s, yn_s, mlp_s):
    tq, d = x_ref.shape[1], x_ref.shape[2]
    tkv = k_ref.shape[1]
    qt = pl.program_id(1)
    it = pl.program_id(2)
    scale = 1.0 / math.sqrt(d_key)

    @pl.when(it == 0)
    def _init():
        # head-major Q cached once per query tile (no per-KV-step Q relayout)
        qh_s[...] = q_ref[0].reshape(tq, n_heads, d_key).transpose(1, 0, 2)
        m_s[...] = jnp.full(m_s.shape, -1e30, m_s.dtype)
        l_s[...] = jnp.zeros(l_s.shape, l_s.dtype)
        att_s[...] = jnp.zeros(att_s.shape, att_s.dtype)

    def _flash_step(masked):
        kt = k_ref[0].reshape(tkv, n_heads, d_key).transpose(1, 0, 2)
        vt = v_ref[0].reshape(tkv, n_heads, d_key).transpose(1, 0, 2)
        s = jnp.einsum("hqd,hkd->hqk", qh_s[...], kt,
                       preferred_element_type=jnp.float32) * scale
        if masked:
            # only the diagonal tile pays the iota/compare/select causal mask
            rows = lax.broadcasted_iota(jnp.int32, (1, tq, tkv), 1)
            cols = lax.broadcasted_iota(jnp.int32, (1, tq, tkv), 2)
            s = jnp.where(cols <= rows, s, -1e30)
        m_prev = m_s[...]
        m_new = jnp.maximum(m_prev, jnp.max(s, axis=-1, keepdims=True))
        alpha = jnp.exp(m_prev - m_new)
        p = jnp.exp(s - m_new)
        l_s[...] = alpha * l_s[...] + jnp.sum(p, axis=-1, keepdims=True)
        att_s[...] = alpha * att_s[...] + jnp.einsum(
            "hqk,hkd->hqd", p.astype(jnp.bfloat16), vt,
            preferred_element_type=jnp.float32)
        m_s[...] = m_new

    # Full (unmasked) KV tiles strictly below the diagonal tile (TKV == TQ).
    @pl.when(it < qt)
    def _full_tile():
        _flash_step(False)

    # Diagonal KV tile — the only masked one.
    @pl.when(it == qt)
    def _diag_tile():
        _flash_step(True)

    # KV tiles with qt < it < n_kv are fully masked: compute skipped entirely.

    @pl.when(it == n_kv)
    def _finalize_attention():
        attn = att_s[...] / l_s[...]                       # (H, TQ, dk) f32
        attn = attn.transpose(1, 0, 2).reshape(tq, d).astype(jnp.bfloat16)
        y1 = (x_ref[0]
              + jnp.dot(attn, wo_ref[...], preferred_element_type=jnp.float32)
              + bo_ref[0])
        y1_s[...] = y1
        yn_s[...] = _layernorm(y1, g2_ref[0], bt2_ref[0]).astype(jnp.bfloat16)
        mlp_s[...] = jnp.zeros(mlp_s.shape, mlp_s.dtype)

    @pl.when(it >= n_kv)
    def _mlp_chunk():
        # d_ff-tiled MLP chunk: W1/W2 streamed through VMEM by the grid axis.
        h = jnp.dot(yn_s[...], w1_ref[...],
                    preferred_element_type=jnp.float32) + b1_ref[0]
        h = _gelu_exact(h)
        mlp_s[...] += jnp.dot(h.astype(jnp.bfloat16), w2_ref[...],
                              preferred_element_type=jnp.float32)

    @pl.when(it == pl.num_programs(2) - 1)
    def _writeback():
        # TODO(synk): nn.Dropout applied as identity (inference semantics).
        out_ref[0] = (y1_s[...] + mlp_s[...] + b2_ref[0]).astype(out_ref.dtype)


# ------------------------ kernel 3: final LN + LM head ------------------------
def lm_head_kernel(x_ref, g_ref, b_ref, w_ref, o_ref):
    xn = _layernorm(x_ref[0], g_ref[0], b_ref[0]).astype(jnp.bfloat16)
    o_ref[0] = jnp.dot(xn, w_ref[...],
                       preferred_element_type=jnp.float32).astype(o_ref.dtype)


# --------------------------------- wrappers ------------------------------------
def prepare_params(params):
    """One-time weight prep: QKV concat + bf16 casts hoisted out of the forward."""
    bf16 = jnp.bfloat16
    prepared = {
        "tok_emb": params["tok_emb"],
        "pos_emb": params["pos_emb"],
        "lnf_g": params["lnf_g"],
        "lnf_b": params["lnf_b"],
        "w_out": params["w_out"].astype(bf16),
        "layers": [],
    }
    for p in params["layers"]:
        prepared["layers"].append({
            "ln1_g": p["ln1_g"], "ln1_b": p["ln1_b"],
            "wqkv": jnp.concatenate([p["wq"], p["wk"], p["wv"]], axis=1).astype(bf16),
            "bqkv": jnp.concatenate([p["bq"], p["bk"], p["bv"]], axis=1),
            "wo": p["wo"].astype(bf16), "bo": p["bo"],
            "ln2_g": p["ln2_g"], "ln2_b": p["ln2_b"],
            "w1": p["w1"].astype(bf16), "b1": p["b1"],
            "w2": p["w2"].astype(bf16), "b2": p["b2"],
        })
    return prepared


def decoder_block(x, p, *, n_heads):
    B, S, D = x.shape
    assert D % n_heads == 0
    d_key = D // n_heads
    F = p["w1"].shape[1]

    tq_pref, cf_pref = _tile_prefs()
    TQ = _seq_tile(S, tq_pref)      # query / row tile
    TKV = TQ                        # KV tile (diagonal-tile logic needs TKV == TQ)
    CF = _ff_tile(F, cf_pref)       # d_ff chunk streamed through VMEM
    NKV = S // TKV
    NF = F // CF
    bf16 = jnp.bfloat16
    vmem_limit = _vmem_limit_bytes()

    # ---- kernel 1: LN1 + fused QKV projection ----
    q, k, v = pl.pallas_call(
        ln1_qkv_kernel,
        grid=(B, S // TQ),
        in_specs=[
            pl.BlockSpec((1, TQ, D), lambda b, s: (b, s, 0)),
            pl.BlockSpec((1, D), lambda b, s: (0, 0)),
            pl.BlockSpec((1, D), lambda b, s: (0, 0)),
            pl.BlockSpec((D, 3 * D), lambda b, s: (0, 0)),
            pl.BlockSpec((1, 3 * D), lambda b, s: (0, 0)),
        ],
        out_specs=[pl.BlockSpec((1, TQ, D), lambda b, s: (b, s, 0))] * 3,
        out_shape=[jax.ShapeDtypeStruct((B, S, D), bf16)] * 3,
        compiler_params=pltpu.CompilerParams(
            dimension_semantics=("parallel", "parallel"),
            vmem_limit_bytes=vmem_limit),
    )(x, p["ln1_g"], p["ln1_b"], p["wqkv"], p["bqkv"])

    # ---- kernel 2: streamed-KV flash attention + Wo + residual + LN2 + MLP ----
    kernel = functools.partial(attn_mlp_kernel, n_heads, d_key, NKV)
    kv_idx = lambda b, qt, it: (b, jnp.minimum(it, NKV - 1), 0)
    ff_idx = lambda it: jnp.maximum(it - NKV, 0)
    return pl.pallas_call(
        kernel,
        grid=(B, S // TQ, NKV + NF),
        in_specs=[
            pl.BlockSpec((1, TQ, D), lambda b, qt, it: (b, qt, 0)),    # x (residual)
            pl.BlockSpec((1, TQ, D), lambda b, qt, it: (b, qt, 0)),    # q tile
            pl.BlockSpec((1, TKV, D), kv_idx),                         # k tile (streamed)
            pl.BlockSpec((1, TKV, D), kv_idx),                         # v tile (streamed)
            pl.BlockSpec((D, D), lambda b, qt, it: (0, 0)),            # wo
            pl.BlockSpec((1, D), lambda b, qt, it: (0, 0)),            # bo
            pl.BlockSpec((1, D), lambda b, qt, it: (0, 0)),            # ln2 gamma
            pl.BlockSpec((1, D), lambda b, qt, it: (0, 0)),            # ln2 beta
            pl.BlockSpec((D, CF), lambda b, qt, it: (0, ff_idx(it))),  # w1 chunk
            pl.BlockSpec((1, CF), lambda b, qt, it: (0, ff_idx(it))),  # b1 chunk
            pl.BlockSpec((CF, D), lambda b, qt, it: (ff_idx(it), 0)),  # w2 chunk
            pl.BlockSpec((1, D), lambda b, qt, it: (0, 0)),            # b2
        ],
        out_specs=pl.BlockSpec((1, TQ, D), lambda b, qt, it: (b, qt, 0)),
        out_shape=jax.ShapeDtypeStruct((B, S, D), x.dtype),
        scratch_shapes=[
            pltpu.VMEM((n_heads, TQ, d_key), bf16),        # head-major Q cache
            pltpu.VMEM((n_heads, TQ, 1), jnp.float32),     # running max
            pltpu.VMEM((n_heads, TQ, 1), jnp.float32),     # running denom
            pltpu.VMEM((n_heads, TQ, d_key), jnp.float32), # attention accumulator
            pltpu.VMEM((TQ, D), jnp.float32),              # y1 (attention residual)
            pltpu.VMEM((TQ, D), bf16),                     # LN2(y1)
            pltpu.VMEM((TQ, D), jnp.float32),              # MLP accumulator
        ],
        compiler_params=pltpu.CompilerParams(
            dimension_semantics=("parallel", "parallel", "arbitrary"),
            vmem_limit_bytes=vmem_limit),
    )(x, q, k, v, p["wo"], p["bo"], p["ln2_g"], p["ln2_b"],
      p["w1"], p["b1"], p["w2"], p["b2"])


def lm_head(x, gamma, beta, w_out_bf16):
    B, S, D = x.shape
    V = w_out_bf16.shape[1]
    TS = _seq_tile(S, _tile_prefs()[0])
    TV = _vocab_tile(V)
    return pl.pallas_call(
        lm_head_kernel,
        grid=(B, S // TS, V // TV),
        in_specs=[
            pl.BlockSpec((1, TS, D), lambda b, s, v: (b, s, 0)),
            pl.BlockSpec((1, D), lambda b, s, v: (0, 0)),
            pl.BlockSpec((1, D), lambda b, s, v: (0, 0)),
            pl.BlockSpec((D, TV), lambda b, s, v: (0, v)),
        ],
        out_specs=pl.BlockSpec((1, TS, TV), lambda b, s, v: (b, s, v)),
        out_shape=jax.ShapeDtypeStruct((B, S, V), jnp.float32),
        compiler_params=pltpu.CompilerParams(
            dimension_semantics=("parallel", "parallel", "parallel"),
            vmem_limit_bytes=_vmem_limit_bytes()),
    )(x, gamma, beta, w_out_bf16)


def gpt_forward(ids, prepared, *, n_heads):
    B, T = ids.shape
    # TODO(synk): token-embedding gather + position add kept in plain JAX (row
    # gather has no clean rectangular BlockSpec); the cross-entropy loss branch
    # (targets != None) is not implemented — inference returns logits only.
    x = (prepared["tok_emb"][ids] + prepared["pos_emb"][:T][None, :, :]).astype(jnp.float32)
    for layer in prepared["layers"]:
        x = decoder_block(x, layer, n_heads=n_heads)
    return lm_head(x, prepared["lnf_g"], prepared["lnf_b"], prepared["w_out"])


# -------------------- pure-JAX reference (same bf16 math) ---------------------
def _mm_ref(a, w):
    return jnp.dot(a.astype(jnp.bfloat16), w.astype(jnp.bfloat16),
                   preferred_element_type=jnp.float32)


def decoder_block_ref(x, p, n_heads):
    B, S, D = x.shape
    dk = D // n_heads
    xn = _layernorm(x, p["ln1_g"][0], p["ln1_b"][0])
    q = (_mm_ref(xn, p["wq"]) + p["bq"][0]).astype(jnp.bfloat16)
    k = (_mm_ref(xn, p["wk"]) + p["bk"][0]).astype(jnp.bfloat16)
    v = (_mm_ref(xn, p["wv"]) + p["bv"][0]).astype(jnp.bfloat16)
    q = q.reshape(B, S, n_heads, dk).transpose(0, 2, 1, 3)
    k = k.reshape(B, S, n_heads, dk).transpose(0, 2, 1, 3)
    v = v.reshape(B, S, n_heads, dk).transpose(0, 2, 1, 3)
    s = jnp.einsum("bhqd,bhkd->bhqk", q, k,
                   preferred_element_type=jnp.float32) / math.sqrt(dk)
    causal = jnp.tril(jnp.ones((S, S), bool))
    s = jnp.where(causal, s, -jnp.inf)
    a = jax.nn.softmax(s, axis=-1)
    o = jnp.einsum("bhqk,bhkd->bhqd", a.astype(jnp.bfloat16), v,
                   preferred_element_type=jnp.float32)
    o = o.transpose(0, 2, 1, 3).reshape(B, S, D)
    y1 = x + _mm_ref(o, p["wo"]) + p["bo"][0]
    yn = _layernorm(y1, p["ln2_g"][0], p["ln2_b"][0])
    h = _gelu_exact(_mm_ref(yn, p["w1"]) + p["b1"][0])
    return y1 + _mm_ref(h, p["w2"]) + p["b2"][0]


def gpt_ref(ids, params, n_heads):
    B, T = ids.shape
    x = (params["tok_emb"][ids] + params["pos_emb"][:T][None, :, :]).astype(jnp.float32)
    for layer in params["layers"]:
        x = decoder_block_ref(x, layer, n_heads)
    xn = _layernorm(x, params["lnf_g"][0], params["lnf_b"][0])
    return _mm_ref(xn, params["w_out"])


# ------------------------------- initialization --------------------------------
def init_gpt_params(key, vocab_size, block_size, d_model, n_heads, n_layers):
    d_ff = 4 * d_model
    keys = iter(jax.random.split(key, 3 + 12 * n_layers))

    def nrm(shape, scale):
        return jax.random.normal(next(keys), shape, jnp.float32) * scale

    sc, scf = 1.0 / math.sqrt(d_model), 1.0 / math.sqrt(d_ff)
    layers = []
    for _ in range(n_layers):
        layers.append({
            "ln1_g": jnp.ones((1, d_model), jnp.float32),
            "ln1_b": jnp.zeros((1, d_model), jnp.float32),
            "wq": nrm((d_model, d_model), sc), "bq": nrm((1, d_model), 0.01),
            "wk": nrm((d_model, d_model), sc), "bk": nrm((1, d_model), 0.01),
            "wv": nrm((d_model, d_model), sc), "bv": nrm((1, d_model), 0.01),
            "wo": nrm((d_model, d_model), sc), "bo": nrm((1, d_model), 0.01),
            "ln2_g": jnp.ones((1, d_model), jnp.float32),
            "ln2_b": jnp.zeros((1, d_model), jnp.float32),
            "w1": nrm((d_model, d_ff), sc), "b1": nrm((1, d_ff), 0.01),
            "w2": nrm((d_ff, d_model), scf), "b2": nrm((1, d_model), 0.01),
        })
    return {
        "tok_emb": nrm((vocab_size, d_model), 0.02),
        "pos_emb": nrm((block_size, d_model), 0.02),
        "layers": layers,
        "lnf_g": jnp.ones((1, d_model), jnp.float32),
        "lnf_b": jnp.zeros((1, d_model), jnp.float32),
        "w_out": nrm((d_model, vocab_size), sc),
    }


if __name__ == "__main__":
    # Small GPT consistent with the module: vocab=256, block=64, d_model=128,
    # n_heads=4, n_layers=2 (d_model kept a multiple of 128 for lane-dense tiles).
    VOCAB, BLOCK, D_MODEL, N_HEADS, N_LAYERS = 256, 64, 128, 4, 2
    B, T = 2, 64

    root = jax.random.PRNGKey(0)
    k_param, k_ids = jax.random.split(root)
    params = init_gpt_params(k_param, VOCAB, BLOCK, D_MODEL, N_HEADS, N_LAYERS)
    prepared = prepare_params(params)           # one-time concat + bf16 casts
    ids = jax.random.randint(k_ids, (B, T), 0, VOCAB, dtype=jnp.int32)

    logits = gpt_forward(ids, prepared, n_heads=N_HEADS)
    logits = jax.block_until_ready(logits)

    ref = gpt_ref(ids, params, N_HEADS)
    assert logits.shape == (B, T, VOCAB)
    err = float(jnp.max(jnp.abs(logits - ref)))
    # bf16 MXU inputs / flash vs. dense softmax ordering => bf16-level tolerance.
    assert jnp.allclose(logits, ref, atol=5e-2, rtol=5e-2), f"max abs err = {err}"
    print("KERNEL_OK")
</pallas_src>

<mosaic_0001>
module attributes {stable_mosaic.version = 11 : i64} {
  func.func @ln1_qkv_kernel(%arg0: i32, %arg1: i32, %arg2: memref<1x64x128xf32, #tpu.memory_space<vmem>>, %arg3: memref<1x128xf32, #tpu.memory_space<vmem>>, %arg4: memref<1x128xf32, #tpu.memory_space<vmem>>, %arg5: memref<128x384xbf16, #tpu.memory_space<vmem>>, %arg6: memref<1x384xf32, #tpu.memory_space<vmem>>, %arg7: memref<1x64x128xbf16, #tpu.memory_space<vmem>>, %arg8: memref<1x64x128xbf16, #tpu.memory_space<vmem>>, %arg9: memref<1x64x128xbf16, #tpu.memory_space<vmem>>) attributes {dimension_semantics = [#tpu.dimension_semantics<parallel>, #tpu.dimension_semantics<parallel>], iteration_bounds = array<i64: 2, 1>, scalar_prefetch = 0 : i64, scratch_operands = 0 : i64, tpu.core_type = #tpu.core_type<tc>, window_params = [{transform_indices = @transform_0, window_bounds = array<i64: 1, 64, 128>}, {pipeline_mode = #tpu.pipeline_mode<synchronous>, transform_indices = @transform_1, window_bounds = array<i64: 1, 128>}, {pipeline_mode = #tpu.pipeline_mode<synchronous>, transform_indices = @transform_2, window_bounds = array<i64: 1, 128>}, {pipeline_mode = #tpu.pipeline_mode<synchronous>, transform_indices = @transform_3, window_bounds = array<i64: 128, 384>}, {pipeline_mode = #tpu.pipeline_mode<synchronous>, transform_indices = @transform_4, window_bounds = array<i64: 1, 384>}, {transform_indices = @transform_5, window_bounds = array<i64: 1, 64, 128>}, {transform_indices = @transform_6, window_bounds = array<i64: 1, 64, 128>}, {transform_indices = @transform_7, window_bounds = array<i64: 1, 64, 128>}]} {
    %c0 = arith.constant 0 : index
    %c0_0 = arith.constant 0 : index
    %c0_1 = arith.constant 0 : index
    %0 = vector.load %arg2[%c0, %c0_0, %c0_1] : memref<1x64x128xf32, #tpu.memory_space<vmem>>, vector<1x64x128xf32>
    %1 = vector.shape_cast %0 : vector<1x64x128xf32> to vector<64x128xf32>
    %c0_2 = arith.constant 0 : index
    %c0_3 = arith.constant 0 : index
    %2 = vector.load %arg3[%c0_2, %c0_3] : memref<1x128xf32, #tpu.memory_space<vmem>>, vector<1x128xf32>
    %3 = vector.shape_cast %2 : vector<1x128xf32> to vector<128xf32>
    %c0_4 = arith.constant 0 : index
    %c0_5 = arith.constant 0 : index
    %4 = vector.load %arg4[%c0_4, %c0_5] : memref<1x128xf32, #tpu.memory_space<vmem>>, vector<1x128xf32>
    %5 = vector.shape_cast %4 : vector<1x128xf32> to vector<128xf32>
    %cst = arith.constant dense<0.000000e+00> : vector<64xf32>
    %6 = vector.multi_reduction <add>, %1, %cst [1] : vector<64x128xf32> to vector<64xf32>
    %7 = vector.shape_cast %6 : vector<64xf32> to vector<64x1xf32>
    %cst_6 = arith.constant 1.280000e+02 : f32
    %8 = vector.broadcast %cst_6 : f32 to vector<64x1xf32>
    %9 = arith.divf %7, %8 : vector<64x1xf32>
    %10 = vector.broadcast %9 : vector<64x1xf32> to vector<64x128xf32>
    %11 = arith.subf %1, %10 : vector<64x128xf32>
    %12 = arith.mulf %11, %11 : vector<64x128xf32>
    %cst_7 = arith.constant dense<0.000000e+00> : vector<64xf32>
    %13 = vector.multi_reduction <add>, %12, %cst_7 [1] : vector<64x128xf32> to vector<64xf32>
    %14 = vector.shape_cast %13 : vector<64xf32> to vector<64x1xf32>
    %cst_8 = arith.constant 1.280000e+02 : f32
    %15 = vector.broadcast %cst_8 : f32 to vector<64x1xf32>
    %16 = arith.divf %14, %15 : vector<64x1xf32>
    %17 = vector.broadcast %9 : vector<64x1xf32> to vector<64x128xf32>
    %18 = arith.subf %1, %17 : vector<64x128xf32>
    %cst_9 = arith.constant 9.99999974E-6 : f32
    %19 = vector.broadcast %cst_9 : f32 to vector<64x1xf32>
    %20 = arith.addf %16, %19 : vector<64x1xf32>
    %21 = math.rsqrt %20 : vector<64x1xf32>
    %22 = vector.broadcast %21 : vector<64x1xf32> to vector<64x128xf32>
    %23 = arith.mulf %18, %22 : vector<64x128xf32>
    %24 = vector.shape_cast %3 : vector<128xf32> to vector<1x128xf32>
    %25 = vector.broadcast %24 : vector<1x128xf32> to vector<64x128xf32>
    %26 = arith.mulf %23, %25 : vector<64x128xf32>
    %27 = vector.shape_cast %5 : vector<128xf32> to vector<1x128xf32>
    %28 = vector.broadcast %27 : vector<1x128xf32> to vector<64x128xf32>
    %29 = arith.addf %26, %28 : vector<64x128xf32>
    %30 = arith.truncf %29 : vector<64x128xf32> to vector<64x128xbf16>
    %c0_10 = arith.constant 0 : index
    %c0_11 = arith.constant 0 : index
    %31 = vector.load %arg5[%c0_10, %c0_11] : memref<128x384xbf16, #tpu.memory_space<vmem>>, vector<128x128xbf16>
    %cst_12 = arith.constant dense<0.000000e+00> : vector<64x128xf32>
    %32 = tpu.matmul %30, %31, %cst_12 {dimension_numbers = #tpu.dot_dimension_numbers<[1], [0], [0], [1], [0, 0, 1, 1], [], []>} : vector<64x128xbf16>, vector<128x128xbf16>, vector<64x128xf32> -> vector<64x128xf32>
    %c0_13 = arith.constant 0 : index
    %c0_14 = arith.constant 0 : index
    %33 = vector.load %arg6[%c0_13, %c0_14] : memref<1x384xf32, #tpu.memory_space<vmem>>, vector<1x128xf32>
    %34 = vector.shape_cast %33 : vector<1x128xf32> to vector<128xf32>
    %35 = vector.shape_cast %34 : vector<128xf32> to vector<1x128xf32>
    %36 = vector.broadcast %35 : vector<1x128xf32> to vector<64x128xf32>
    %37 = arith.addf %32, %36 : vector<64x128xf32>
    %38 = arith.truncf %37 : vector<64x128xf32> to vector<64x128xbf16>
    %c0_15 = arith.constant 0 : index
    %c0_16 = arith.constant 0 : index
    %c0_17 = arith.constant 0 : index
    %39 = vector.load %arg7[%c0_15, %c0_16, %c0_17] : memref<1x64x128xbf16, #tpu.memory_space<vmem>>, vector<1x64x128xbf16>
    %40 = vector.shape_cast %39 : vector<1x64x128xbf16> to vector<64x128xbf16>
    %41 = vector.shape_cast %38 : vector<64x128xbf16> to vector<1x64x128xbf16>
    tpu.vector_store %arg7[%c0_15, %c0_16, %c0_17], %41 {strides = array<i32>} : memref<1x64x128xbf16, #tpu.memory_space<vmem>>, vector<1x64x128xbf16>,
    %c0_18 = arith.constant 0 : index
    %c128 = arith.constant 128 : index
    %42 = vector.load %arg5[%c0_18, %c128] : memref<128x384xbf16, #tpu.memory_space<vmem>>, vector<128x128xbf16>
    %cst_19 = arith.constant dense<0.000000e+00> : vector<64x128xf32>
    %43 = tpu.matmul %30, %42, %cst_19 {dimension_numbers = #tpu.dot_dimension_numbers<[1], [0], [0], [1], [0, 0, 1, 1], [], []>} : vector<64x128xbf16>, vector<128x128xbf16>, vector<64x128xf32> -> vector<64x128xf32>
    %c0_20 = arith.constant 0 : index
    %c128_21 = arith.constant 128 : index
    %44 = vector.load %arg6[%c0_20, %c128_21] : memref<1x384xf32, #tpu.memory_space<vmem>>, vector<1x128xf32>
    %45 = vector.shape_cast %44 : vector<1x128xf32> to vector<128xf32>
    %46 = vector.shape_cast %45 : vector<128xf32> to vector<1x128xf32>
    %47 = vector.broadcast %46 : vector<1x128xf32> to vector<64x128xf32>
    %48 = arith.addf %43, %47 : vector<64x128xf32>
    %49 = arith.truncf %48 : vector<64x128xf32> to vector<64x128xbf16>
    %c0_22 = arith.constant 0 : index
    %c0_23 = arith.constant 0 : index
    %c0_24 = arith.constant 0 : index
    %50 = vector.load %arg8[%c0_22, %c0_23, %c0_24] : memref<1x64x128xbf16, #tpu.memory_space<vmem>>, vector<1x64x128xbf16>
    %51 = vector.shape_cast %50 : vector<1x64x128xbf16> to vector<64x128xbf16>
    %52 = vector.shape_cast %49 : vector<64x128xbf16> to vector<1x64x128xbf16>
    tpu.vector_store %arg8[%c0_22, %c0_23, %c0_24], %52 {strides = array<i32>} : memref<1x64x128xbf16, #tpu.memory_space<vmem>>, vector<1x64x128xbf16>,
    %c0_25 = arith.constant 0 : index
    %c256 = arith.constant 256 : index
    %53 = vector.load %arg5[%c0_25, %c256] : memref<128x384xbf16, #tpu.memory_space<vmem>>, vector<128x128xbf16>
    %cst_26 = arith.constant dense<0.000000e+00> : vector<64x128xf32>
    %54 = tpu.matmul %30, %53, %cst_26 {dimension_numbers = #tpu.dot_dimension_numbers<[1], [0], [0], [1], [0, 0, 1, 1], [], []>} : vector<64x128xbf16>, vector<128x128xbf16>, vector<64x128xf32> -> vector<64x128xf32>
    %c0_27 = arith.constant 0 : index
    %c256_28 = arith.constant 256 : index
    %55 = vector.load %arg6[%c0_27, %c256_28] : memref<1x384xf32, #tpu.memory_space<vmem>>, vector<1x128xf32>
    %56 = vector.shape_cast %55 : vector<1x128xf32> to vector<128xf32>
    %57 = vector.shape_cast %56 : vector<128xf32> to vector<1x128xf32>
    %58 = vector.broadcast %57 : vector<1x128xf32> to vector<64x128xf32>
    %59 = arith.addf %54, %58 : vector<64x128xf32>
    %60 = arith.truncf %59 : vector<64x128xf32> to vector<64x128xbf16>
    %c0_29 = arith.constant 0 : index
    %c0_30 = arith.constant 0 : index
    %c0_31 = arith.constant 0 : index
    %61 = vector.load %arg9[%c0_29, %c0_30, %c0_31] : memref<1x64x128xbf16, #tpu.memory_space<vmem>>, vector<1x64x128xbf16>
    %62 = vector.shape_cast %61 : vector<1x64x128xbf16> to vector<64x128xbf16>
    %63 = vector.shape_cast %60 : vector<64x128xbf16> to vector<1x64x128xbf16>
    tpu.vector_store %arg9[%c0_29, %c0_30, %c0_31], %63 {strides = array<i32>} : memref<1x64x128xbf16, #tpu.memory_space<vmem>>, vector<1x64x128xbf16>,
    return
  }
  func.func @transform_0(%arg0: i32, %arg1: i32) -> (i32, i32, i32) {
    %c0_i32 = arith.constant 0 : i32
    %c0_i32_0 = arith.constant 0 : i32
    return %arg0, %arg1, %c0_i32 : i32, i32, i32
  }
  func.func @transform_1(%arg0: i32, %arg1: i32) -> (i32, i32) {
    %c0_i32 = arith.constant 0 : i32
    %c0_i32_0 = arith.constant 0 : i32
    %c0_i32_1 = arith.constant 0 : i32
    return %c0_i32, %c0_i32_0 : i32, i32
  }
  func.func @transform_2(%arg0: i32, %arg1: i32) -> (i32, i32) {
    %c0_i32 = arith.constant 0 : i32
    %c0_i32_0 = arith.constant 0 : i32
    %c0_i32_1 = arith.constant 0 : i32
    return %c0_i32, %c0_i32_0 : i32, i32
  }
  func.func @transform_3(%arg0: i32, %arg1: i32) -> (i32, i32) {
    %c0_i32 = arith.constant 0 : i32
    %c0_i32_0 = arith.constant 0 : i32
    %c0_i32_1 = arith.constant 0 : i32
    return %c0_i32, %c0_i32_0 : i32, i32
  }
  func.func @transform_4(%arg0: i32, %arg1: i32) -> (i32, i32) {
    %c0_i32 = arith.constant 0 : i32
    %c0_i32_0 = arith.constant 0 : i32
    %c0_i32_1 = arith.constant 0 : i32
    return %c0_i32, %c0_i32_0 : i32, i32
  }
  func.func @transform_5(%arg0: i32, %arg1: i32) -> (i32, i32, i32) {
    %c0_i32 = arith.constant 0 : i32
    %c0_i32_0 = arith.constant 0 : i32
    return %arg0, %arg1, %c0_i32 : i32, i32, i32
  }
  func.func @transform_6(%arg0: i32, %arg1: i32) -> (i32, i32, i32) {
    %c0_i32 = arith.constant 0 : i32
    %c0_i32_0 = arith.constant 0 : i32
    return %arg0, %arg1, %c0_i32 : i32, i32, i32
  }
  func.func @transform_7(%arg0: i32, %arg1: i32) -> (i32, i32, i32) {
    %c0_i32 = arith.constant 0 : i32
    %c0_i32_0 = arith.constant 0 : i32
    return %arg0, %arg1, %c0_i32 : i32, i32, i32
  }
}

</mosaic_0001>

<bundles_post_ra>
// kernel: tpu_custom_call.1
= control target key start
LH: loop header
LB: loop body
LE: loop exit
PB: predicated region body
PF: predicated region fallthrough
CT: control target
= control target key end

     0   :  { %s2260_s0 = inlined_call_operand.hbm [shape: f32[2,64,128], index: 0, kind: input, shape index: {}]   ;;  %s2261_s1 = inlined_call_operand.hbm [shape: f32[1,128], index: 1, kind: input, shape index: {}]   ;;  %s2262_s2 = inlined_call_operand.hbm [shape: f32[1,128], index: 2, kind: input, shape index: {}]   ;;  %s2263_s3 = inlined_call_operand.hbm [shape: bf16[128,384], index: 3, kind: input, shape index: {}]   ;;  %s2264_s4 = inlined_call_operand.vmem [shape: f32[1,384], index: 4, kind: input, shape index: {}]   ;;  %s2265_s5 = inlined_call_operand.hbm [shape: bf16[2,64,128], index: 5, kind: output, shape index: {0}]   ;;  %s2266_s6 = inlined_call_operand.hbm [shape: bf16[2,64,128], index: 6, kind: output, shape index: {1}]   ;;  %s2267_s7 = inlined_call_operand.hbm [shape: bf16[2,64,128], index: 7, kind: output, shape index: {2}]  }
   0x1   :  { %2271 = sst [smem:[#allocation21_spill]] %s2260_s0 }
   0x2   :  { %2272 = sst [smem:[#allocation22_spill]] %s2261_s1 }
   0x3   :  { %2273 = sst [smem:[#allocation23_spill]] %s2262_s2 }
   0x4   :  { %2274 = sst [smem:[#allocation24_spill]] %s2263_s3 }
   0x5   :  { %13 = vsyncpa [#allocation3], 0 }
   0x6   :  { %15 = vsyncpa [#allocation3 + $0x1], 0 }
   0x7   :  { %16 = vsyncpa [#allocation6], 0 }
   0x8   :  { %17 = vsyncpa [#allocation9], 0 }
   0x9   :  { %18 = vsyncpa [#allocation4], 0 }
   0xa   :  { %20 = vsyncpa [#allocation4 + $0x1], 0 }
   0xb   :  { %21 = vsyncpa [#allocation12], 0 }
   0xc   :  { %23 = vsyncpa [#allocation12 + $0x1], 0  ;;  %s1867_s24 = smov 0   ;;  %s1869_s25 = smov 0  }
   0xd   :  { %s1871_s26 = smov 0   ;;  %s1873_s27 = smov 0  }
   0xe   :  { %s1875_s28 = smov 0   ;;  %s1877_s29 = smov 0  }
   0xf LB: > { %s1898_s30 = sadd.s32 4294967295, %s1815_s29   ;;  %s2268_s8 = sadd.s32 4294967294, %s1815_s29   ;;  %s1815_s29 = sphi %s1877_s29, %s29_s29   ;;  %s1811_s28 = sphi %s1875_s28, %s2294_s28   ;;  %s1807_s27 = sphi %s1873_s27, %s2293_s27   ;;  %s1803_s26 = sphi %s1871_s26, %s2292_s26   ;;  %s1799_s25 = sphi %s1869_s25, %s2291_s25   ;;  %s1795_s24 = sphi %s1867_s24, %s2290_s24  }
  0x10   : > { %p63_p0 = scmp.ne.s32.totalorder %s1799_s25, %s1795_s24  ;;  %p64_p1 = scmp.eq.s32.totalorder %s1898_s30, 0 }
  0x11   : > { %p173_p2 = scmp.eq.s32.totalorder %s1898_s30, 1  ;;  %p179_p3 = scmp.eq.s32.totalorder %s2268_s8, 1 }
  0x12   : > { %p1909_p4 = por %p64_p1, %p63_p0  ;;  %p1184_p5 = scmp.ge.s32.totalorder %s1815_s29, 1 }
  0x13   : > { %p1914_p6 = por %p179_p3, %p63_p0  ;;  %p242_p7 = scmp.lt.s32.totalorder %s1815_s29, 3 }
  0x14   : > { %s2278_s1 = sld [smem:[#allocation22_spill]]  ;;  %p1188_p9 = scmp.ge.s32.totalorder %s1815_s29, 2 }
  0x15   : > { %s2276_s10 = scalar_select %p1914_p6, 1, 0 }
  0x16   : > { %p1922_p8 = pnand %p1184_p5, %p242_p7  ;;  %s1817_s15 = smov [#allocation5]  }
  0x17   : > { %2277 = sst [smem:[#allocation19_spill]] %s2276_s10  ;;  %s256_s16 = sshll.u32 %s1817_s15, 4  ;;  %s257_s16 = int_to_ptr.vmem [resolvable:$true] %s256_s16 }
  0x18   : > { %p1432_p10 = pneg %p1922_p8  ;;  %s2280_s2 = sld [smem:[#allocation23_spill]] }
  0x19   : > { %s2282_s3 = sld [smem:[#allocation24_spill]]  ;;  %s1818_s11 = smov [#allocation7]  }
  0x1a   : > { %s254_s13 = sshll.u32 %s2278_s1, 4  ;;  %p1934_p11 = pnand %p1432_p10, %p64_p1  ;;  %s255_s13 = int_to_ptr.hbm [resolvable:$true] %s254_s13 }
  0x1b   : > { %s268_s12 = sshll.u32 %s1818_s11, 4  ;;  %s1819_s15 = smov [#allocation8]   ;;  %s269_s12 = int_to_ptr.vmem [resolvable:$true] %s268_s12 }
  0x1c   : > { %1435 = dma.hbm_to_vmem [thread:$0]  (!%p1934_p11), %s255_s13, 16, %s257_s16, [#allocation6]  }
  0x1d   : > { %s279_s17 = sshll.u32 %s1819_s15, 4  ;;  %s1820_s18 = smov 192   ;;  %s280_s17 = int_to_ptr.vmem [resolvable:$true] %s279_s17 }
  0x1e   : > { %s266_s19 = sshll.u32 %s2280_s2, 4  ;;  %s1821_s21 = smov 12   ;;  %s267_s19 = int_to_ptr.hbm [resolvable:$true] %s266_s19 }
  0x1f   : > { %s277_s23 = sshll.u32 %s2282_s3, 4  ;;  %s50_s22 = sadd.s32 1, %s1803_s26  ;;  %s278_s23 = int_to_ptr.hbm [resolvable:$true] %s277_s23 }
  0x20   : > { %1438 = dma.hbm_to_vmem [thread:$0]  (!%p1934_p11), %s267_s19, 16, %s269_s12, [#allocation6]  }
  0x21   : > { %1441 = dma.hbm_to_vmem [thread:$0]  (!%p1934_p11), %s278_s23, 3072, %s280_s17, [#allocation9], %s1820_s18, %s1820_s18, %s1821_s21  }
  0x22   : > { %s41_s11 = sadd.s32 1, %s1811_s28  ;;  %p57_p12 = scmp.ne.s32.totalorder %s1803_s26, %s1799_s25 }
  0x23   : > { %p43_p13 = scmp.ge.s32.totalorder %s41_s11, 2  ;;  %p58_p0 = scmp.eq.s32.totalorder %s1815_s29, 0 }
  0x24   : > { %p1954_p3 = por %p173_p2, %p57_p12  ;;  %p1459_p5 = scmp.lt.s32.totalorder %s1815_s29, 2 }
  0x25   : > { %s2296_s11 = smov (%p43_p13, %s41_s11), 0  ;;  %p1961_p7 = por %p58_p0, %p57_p12 }
  0x26   : > { %2284 = sst [smem:[#allocation20_spill]] %s2296_s11  ;;  %s296_s19 = sand.u32 1, %s1803_s26  }
  0x27   : > { %s45_s20 = ssub.s32 %s1811_s28, %s2296_s11  ;;  %s1189_s23 = sshll.u32 %s296_s19, 6 }
  0x28   : > { %p48_p10 = scmp.eq.s32.totalorder %s45_s20, 0  ;;  %s1307_s12 = sshll.u32 %s1811_s28, 6 }
  0x29   : > { %s2286_s0 = sld [smem:[#allocation21_spill]]  ;;  %s300_s8 = scalar_lea.vmem [#allocation2], %s1189_s23 }
  0x2a   : > { %s1970_s15 = scalar_select %p48_p10, %s1803_s26, %s50_s22  }
  0x2b   : > { %s310_s1 = sshll.u32 %s300_s8, 4  ;;  %p1443_p2 = pnand %p1459_p5, %p1961_p7  ;;  %s311_s1 = int_to_ptr.vmem [resolvable:$true] %s310_s1 }
  0x2c   : > { %s297_s3 = scalar_lea.sflag [#allocation3], %s296_s19  ;;  %s1822_s10 = smov 128  }
  0x2d   : > { %s1823_s11 = smov 8   ;;  %322 = sbr.rel (%p1922_p8) target bundleno = 625 (0x271), region = 40 }
  0x2e   : > { %s1982_s22 = sand.u32 (!%p1922_p8), 1, %s1799_s25  }
  0x2f   : > { %s307_s21 = scalar_lea.hbm %s2286_s0, %s1307_s12  ;;  %s1193_s8 = sshll.u32 (!%p1922_p8), %s1982_s22, 6 }
  0x30   : > { %s308_s2 = sshll.u32 %s307_s21, 4  ;;  %s325_s20 = scalar_lea.sflag (!%p1922_p8), [#allocation3], %s1982_s22  ;;  %s309_s2 = int_to_ptr.hbm [resolvable:$true] %s308_s2 }
  0x31   : > { %1445 = dma.hbm_to_vmem [thread:$0]  (!%p1443_p2), %s309_s2, 1024, %s311_s1, %s297_s3, %s1822_s10, %s1822_s10, %s1823_s11  }
  0x32   : > { %s1986_s23 = scalar_lea.vmem [#allocation2], %s1193_s8 }
  0x33   : > { %1774 = dma.done.wait (%p1909_p4), %s325_s20, 1024  }
  0x34   : > { %1776 = vsyncadd (%p1909_p4), %s325_s20, 4294966272 }
  0x35   : > { %1778 = dma.done.wait (%p64_p1), [#allocation6], 32  }
  0x36   : > { %1780 = vsyncadd (%p64_p1), [#allocation6], 4294967264 }
  0x37   : > { %1782 = dma.done.wait (%p64_p1), [#allocation9], 3072  }
  0x38   : > { %1784 = vsyncadd (%p64_p1), [#allocation9], 4294964224  ;;  %v393_v0 = vld [vmem:[%s1986_s23 + $0x20] sm:$0xff]  ;;  %v391_v1 = vld [vmem:[%s1986_s23 + $0x10] sm:$0xff]  ;;  %v1824_v7 = vmov 128.0   ;;  %s1197_s10 = sshll.u32 %s1982_s22, 5 }
  0x39   : > { %v389_v2 = vld [vmem:[%s1986_s23] sm:$0xff]  ;;  %407 = vadd.xlane.f32.xlu2 %v393_v0  ;;  %403 = vadd.xlane.f32.xlu1 %v391_v1  ;;  %v394_v3 = vld [vmem:[%s1986_s23 + $0x28] sm:$0xff]  ;;  %v392_v4 = vld [vmem:[%s1986_s23 + $0x18] sm:$0xff]  ;;  %1527 = vrcp.f32 %v1824_v7  ;;  %s2115_s16 = scalar_lea.vmem [#allocation10], %s1197_s10  ;;  %s2118_s19 = scalar_lea.vmem [#allocation11], %s1197_s10 }
  0x3a   : > { %399 = vadd.xlane.f32.xlu0 %v389_v2  ;;  %v390_v5 = vld [vmem:[%s1986_s23 + $0x8] sm:$0xff]  ;;  %v395_v6 = vld [vmem:[%s1986_s23 + $0x30] sm:$0xff]  ;;  %v2025_v30 = vld [vmem:[%s1986_s23 + $0x38] sm:$0xff]  ;;  %s2123_s12 = scalar_lea.vmem [#allocation13], %s1197_s10  ;;  %s2145_s17 = sshll.u32 %s1807_s27, 5 }
  0x3b   : > { %v1230_v43 = vld [vmem:[#allocation8 + $0xa8] sm:$0xf]  ;;  %v1315_v44 = vld [vmem:[#allocation8 + $0xb0] sm:$0xf0]  ;;  %v1262_v45 = vld [vmem:[#allocation8 + $0xac] sm:$0xf]  ;;  %s974_s8 = scalar_lea.hbm %s2266_s6, %s2145_s17  ;;  %s955_s3 = scalar_lea.hbm %s2265_s5, %s2145_s17 }
  0x3c   : > { %v1231_v46 = vor.u32 %v1315_v44, %v1230_v43  ;;  %v1323_v47 = vld [vmem:[#allocation8 + $0xb4] sm:$0xf0]  ;;  %v1294_v48 = vld [vmem:[#allocation8 + $0xb0] sm:$0xf]  ;;  %v1331_v49 = vld [vmem:[#allocation8 + $0xb8] sm:$0xf0]  ;;  %s993_s14 = scalar_lea.hbm %s2267_s7, %s2145_s17 }
  0x3d   : > { %v1263_v50 = vor.u32 %v1323_v47, %v1262_v45  ;;  %v1295_v51 = vor.u32 %v1331_v49, %v1294_v48  ;;  %v1226_v52 = vld [vmem:[#allocation8 + $0x90] sm:$0xf]  ;;  %v1314_v53 = vld [vmem:[#allocation8 + $0x98] sm:$0xf0]  ;;  %v1258_v54 = vld [vmem:[#allocation8 + $0x94] sm:$0xf] }
  0x3e   : > { %660 = vmatpush.bf16.msra.mxu0 %v1231_v46  ;;  %1404 = vmatpush.bf16.msra.mxu3 %v1231_v46  ;;  %v1227_v55 = vor.u32 %v1314_v53, %v1226_v52  ;;  %v1322_v56 = vld [vmem:[#allocation8 + $0x9c] sm:$0xf0]  ;;  %v1290_v57 = vld [vmem:[#allocation8 + $0x98] sm:$0xf]  ;;  %v1330_v58 = vld [vmem:[#allocation8 + $0xa0] sm:$0xf0] }
  0x3f   : > { %v1528_v8 = vpop.eup %1527  ;;  %773 = vmatpush.bf16.msra.mxu1 %v1263_v50  ;;  %886 = vmatpush.bf16.msra.mxu2 %v1295_v51  ;;  %v1259_v59 = vor.u32 %v1322_v56, %v1258_v54  ;;  %v1291_v60 = vor.u32 %v1330_v58, %v1290_v57  ;;  %v1222_v61 = vld [vmem:[#allocation8 + $0x78] sm:$0xf]  ;;  %v1313_v62 = vld [vmem:[#allocation8 + $0x80] sm:$0xf0]  ;;  %v1254_v63 = vld [vmem:[#allocation8 + $0x7c] sm:$0xf] }
  0x40   : > { %v416_v9 = vmul.f32 128.0, %v1528_v8  ;;  %vm420_vm0 = vweird.f32 %v1528_v8  ;;  %v1312_v7 = vld [vmem:[#allocation8 + $0x68] sm:$0xf0]  ;;  %v1309_v43 = vld [vmem:[#allocation8 + $0x20] sm:$0xf0]  ;;  %s975_s20 = sshll.u32 %s2118_s19, 4  ;;  %s2155_s20 = int_to_ptr.vmem [resolvable:$true] %s975_s20 }
  0x41   : > { %409 = vadd.xlane.f32.xlu2 %v394_v3  ;;  %405 = vadd.xlane.f32.xlu1 %v392_v4  ;;  %v1238_v44 = vld [vmem:[#allocation8 + $0x1c] sm:$0xf]  ;;  %v1317_v46 = vld [vmem:[#allocation8 + $0x24] sm:$0xf0]  ;;  %v1270_v47 = vld [vmem:[#allocation8 + $0x20] sm:$0xf] }
  0x42   : > { %401 = vadd.xlane.f32.xlu0 %v390_v5  ;;  %v417_v10 = vsub.f32 1.0, %v416_v9  ;;  %661 = vmatpush.bf16.msra.mxu0 %v1227_v55  ;;  %v1325_v48 = vld [vmem:[#allocation8 + $0x28] sm:$0xf0]  ;;  %v1239_v50 = vor.u32 %v1317_v46, %v1238_v44  ;;  %v1202_v53 = vld [vmem:[#allocation8] sm:$0xf]  ;;  %s936_s23 = sand.u32 1, %s1898_s30  }
  0x43   : > { %1405 = vmatpush.bf16.msra.mxu3 %v1227_v55  ;;  %774 = vmatpush.bf16.msra.mxu1 %v1259_v59  ;;  %v1271_v51 = vor.u32 %v1325_v48, %v1270_v47  ;;  %v1308_v54 = vld [vmem:[#allocation8 + $0x8] sm:$0xf0]  ;;  %v1234_v55 = vld [vmem:[#allocation8 + $0x4] sm:$0xf]  ;;  %v1316_v58 = vld [vmem:[#allocation8 + $0xc] sm:$0xf0] }
  0x44   : > { %v418_v11 = vmul.f32 %v1528_v8, %v417_v10  ;;  %887 = vmatpush.bf16.msra.mxu2 %v1291_v60  ;;  %v1320_v10 = vld [vmem:[#allocation8 + $0x6c] sm:$0xf0]  ;;  %v1203_v57 = vor.u32 %v1308_v54, %v1202_v53  ;;  %v1266_v59 = vld [vmem:[#allocation8 + $0x8] sm:$0xf]  ;;  %v1235_v60 = vor.u32 %v1316_v58, %v1234_v55  ;;  %s2153_s1 = sshll.u32 %s974_s8, 4  ;;  %s956_s9 = sshll.u32 %s2115_s16, 4  ;;  %s978_s1 = int_to_ptr.hbm [resolvable:$true] %s2153_s1  ;;  %s957_s9 = int_to_ptr.vmem [resolvable:$true] %s956_s9 }
  0x45   : > { %s2170_s11 = scalar_lea.sflag [#allocation12], %s936_s23  ;;  %s1679_s18 = sshra.s32 %s978_s1, 4  ;;  %s1680_s18 = int_to_ptr.hbm [resolvable:$true] %s1679_s18 }
  0x46   : > { %v419_v12 = vadd.f32 %v1528_v8, %v418_v11  ;;  %v1282_v11 = vld [vmem:[#allocation8 + $0x68] sm:$0xf]  ;;  %s1681_s21 = scalar_lea.hbm %s1680_s18, 32  ;;  %s1685_s27 = scalar_lea.hbm %s2266_s6, 64 }
  0x47   : > { %p1682_p1 = scmp.ne.s32.totalorder %s1680_s18, %s1681_s21  ;;  %p1686_p11 = scmp.lt.s32.totalorder %s1680_s18, %s2266_s6 }
  0x48   : > { %v2007_v13 = vsel %vm420_vm0, %v1528_v8, %v419_v12  ;;  %v1250_v8 = vld [vmem:[#allocation8 + $0x64] sm:$0xf]  ;;  %v1328_v12 = vld [vmem:[#allocation8 + $0x70] sm:$0xf0]  ;;  %p1687_p12 = scmp.lt.s32.totalorder %s1685_s27, %s1681_s21 }
  0x49   : > { %411 = vadd.xlane.f32.xlu2 %v395_v6  ;;  %p1683_p4 = pnand %p1682_p1, %p1954_p3 }
  0x4a   : > { %p1688_p13 = por %p1687_p12, %p1686_p11 }
  0x4b   : > { %p1684_p8 = pneg %p1683_p4 }
  0x4d   : > { %p1689_p0 = pnand %p1688_p13, %p1684_p8 }
  0xac   : > { %v408_v14 = vpop.xlane.xlu2 %407  ;;  %v404_v15 = vpop.xlane.xlu1 %403 }
  0xad   : > { %v400_v16 = vpop.xlane.xlu0 %399  ;;  %v426_v26 = vmul.f32 %v2007_v13, %v408_v14  ;;  %v424_v27 = vmul.f32 %v2007_v13, %v404_v15  ;;  %v1251_v14 = vor.u32 %v1320_v10, %v1250_v8  ;;  %v1283_v15 = vor.u32 %v1328_v12, %v1282_v11 }
  0xae   : > { %v422_v17 = vmul.f32 %v2007_v13, %v400_v16  ;;  %v1214_v16 = vld [vmem:[#allocation8 + $0x48] sm:$0xf] }
  0xaf   : > { %v2029_v32 = vsub.f32 %v393_v0, %v426_v26  ;;  %v2031_v33 = vsub.f32 %v391_v1, %v424_v27  ;;  %v1223_v0 = vor.u32 %v1313_v62, %v1222_v61  ;;  %v1321_v1 = vld [vmem:[#allocation8 + $0x84] sm:$0xf0]  ;;  %v1210_v27 = vld [vmem:[#allocation8 + $0x30] sm:$0xf]  ;;  %v1324_v61 = vld [vmem:[#allocation8 + $0x10] sm:$0xf0] }
  0xb0   : > { %v2010_v18 = vsub.f32 %v389_v2, %v422_v17  ;;  %v1286_v2 = vld [vmem:[#allocation8 + $0x80] sm:$0xf]  ;;  %v1311_v17 = vld [vmem:[#allocation8 + $0x50] sm:$0xf0]  ;;  %v1267_v62 = vor.u32 %v1324_v61, %v1266_v59 }
  0xb1   : > { %v442_v38 = vmul.f32 %v2029_v32, %v2029_v32  ;;  %v440_v39 = vmul.f32 %v2031_v33, %v2031_v33  ;;  %662 = vmatpush.bf16.msra.mxu0 %v1223_v0  ;;  %1406 = vmatpush.bf16.msra.mxu3 %v1223_v0 }
  0xb2   : > { %v438_v19 = vmul.f32 %v2010_v18, %v2010_v18 }
  0xb4   : > { %446 = vadd.xlane.f32.xlu0 %v438_v19  ;;  %v410_v20 = vpop.xlane.xlu2 %409  ;;  %v406_v21 = vpop.xlane.xlu1 %405  ;;  %v1246_v19 = vld [vmem:[#allocation8 + $0x4c] sm:$0xf] }
  0xb5   : > { %v425_v22 = vmul.f32 %v2007_v13, %v406_v21  ;;  %v402_v23 = vpop.xlane.xlu0 %401  ;;  %v427_v37 = vmul.f32 %v2007_v13, %v410_v20  ;;  %v1215_v20 = vor.u32 %v1311_v17, %v1214_v16  ;;  %v1319_v21 = vld [vmem:[#allocation8 + $0x54] sm:$0xf0] }
  0xb6   : > { %v423_v24 = vmul.f32 %v2007_v13, %v402_v23  ;;  %v1327_v23 = vld [vmem:[#allocation8 + $0x58] sm:$0xf0] }
  0xb7   : > { %v2016_v25 = vsub.f32 %v392_v4, %v425_v22  ;;  %v2044_v41 = vsub.f32 %v394_v3, %v427_v37  ;;  %v1329_v3 = vld [vmem:[#allocation8 + $0x88] sm:$0xf0]  ;;  %v1255_v4 = vor.u32 %v1321_v1, %v1254_v63  ;;  %v1278_v22 = vld [vmem:[#allocation8 + $0x50] sm:$0xf]  ;;  %v1274_v37 = vld [vmem:[#allocation8 + $0x38] sm:$0xf] }
  0xb8   : > { %v2020_v28 = vsub.f32 %v390_v5, %v423_v24  ;;  %v1287_v5 = vor.u32 %v1329_v3, %v1286_v2  ;;  %v1247_v24 = vor.u32 %v1319_v21, %v1246_v19  ;;  %v1279_v26 = vor.u32 %v1327_v23, %v1278_v22 }
  0xb9   : > { %v441_v29 = vmul.f32 %v2016_v25, %v2016_v25  ;;  %v443_v42 = vmul.f32 %v2044_v41, %v2044_v41  ;;  %775 = vmatpush.bf16.msra.mxu1 %v1255_v4 }
  0xba   : > { %v439_v31 = vmul.f32 %v2020_v28, %v2020_v28  ;;  %888 = vmatpush.bf16.msra.mxu2 %v1287_v5 }
  0xbb   : > { %452 = vadd.xlane.f32.xlu2 %v441_v29  ;;  %v1310_v29 = vld [vmem:[#allocation8 + $0x38] sm:$0xf0] }
  0xbc   : > { %413 = vadd.xlane.f32.xlu0 %v2025_v30  ;;  %448 = vadd.xlane.f32.xlu1 %v439_v31  ;;  %v412_v34 = vpop.xlane.xlu2 %411  ;;  %v1242_v31 = vld [vmem:[#allocation8 + $0x34] sm:$0xf] }
  0xbd   : > { %v428_v35 = vmul.f32 %v2007_v13, %v412_v34  ;;  %776 = vmatpush.bf16.msra.mxu1 %v1251_v14  ;;  %v1211_v34 = vor.u32 %v1310_v29, %v1210_v27 }
  0xbe   : > { %889 = vmatpush.bf16.msra.mxu2 %v1283_v15 }
  0xbf   : > { %v2035_v36 = vsub.f32 %v395_v6, %v428_v35  ;;  %v1218_v6 = vld [vmem:[#allocation8 + $0x60] sm:$0xf] }
  0xc0   : > { %v1219_v9 = vor.u32 %v1312_v7, %v1218_v6  ;;  %v1318_v35 = vld [vmem:[#allocation8 + $0x3c] sm:$0xf0] }
  0xc1   : > { %v444_v40 = vmul.f32 %v2035_v36, %v2035_v36  ;;  %777 = vmatpush.bf16.msra.mxu1 %v1247_v24 }
  0xc2   : > { %663 = vmatpush.bf16.msra.mxu0 %v1219_v9  ;;  %1407 = vmatpush.bf16.msra.mxu3 %v1219_v9 }
  0xc3   : > { %458 = vadd.xlane.f32.xlu2 %v444_v40  ;;  %890 = vmatpush.bf16.msra.mxu2 %v1279_v26 }
  0xc4   : > { %454 = vadd.xlane.f32.xlu0 %v442_v38  ;;  %450 = vadd.xlane.f32.xlu1 %v440_v39  ;;  %v1326_v38 = vld [vmem:[#allocation8 + $0x40] sm:$0xf0]  ;;  %v1243_v39 = vor.u32 %v1318_v35, %v1242_v31 }
  0xc5   : > { %v1275_v40 = vor.u32 %v1326_v38, %v1274_v37 }
  0xc6   : > { %664 = vmatpush.bf16.msra.mxu0 %v1215_v20  ;;  %1408 = vmatpush.bf16.msra.mxu3 %v1215_v20 }
  0xc7   : > { %778 = vmatpush.bf16.msra.mxu1 %v1243_v39  ;;  %891 = vmatpush.bf16.msra.mxu2 %v1275_v40 }
  0xca   : > { %665 = vmatpush.bf16.msra.mxu0 %v1211_v34  ;;  %1409 = vmatpush.bf16.msra.mxu3 %v1211_v34 }
  0xcb   : > { %779 = vmatpush.bf16.msra.mxu1 %v1239_v50  ;;  %892 = vmatpush.bf16.msra.mxu2 %v1271_v51 }
  0xcc   : > { %456 = vadd.xlane.f32.xlu1 %v443_v42  ;;  %v1206_v42 = vld [vmem:[#allocation8 + $0x18] sm:$0xf] }
  0xcd   : > { %v1207_v45 = vor.u32 %v1309_v43, %v1206_v42 }
  0xcf   : > { %666 = vmatpush.bf16.msra.mxu0 %v1207_v45  ;;  %1410 = vmatpush.bf16.msra.mxu3 %v1207_v45  ;;  %v2064_v45 = vld [vmem:[#allocation5] ss:$0 sm:$0xff] }
  0xd0   : > { %780 = vmatpush.bf16.msra.mxu1 %v1235_v60  ;;  %893 = vmatpush.bf16.msra.mxu2 %v1267_v62 }
  0xd3   : > { %667 = vmatpush.bf16.msra.mxu0 %v1203_v57  ;;  %1411 = vmatpush.bf16.msra.mxu3 %v1203_v57  ;;  %v2069_v57 = vld [vmem:[#allocation7] ss:$0 sm:$0xff] }
 0x127   : > { %v447_v49 = vpop.xlane.xlu0 %446 }
 0x128   : > { %v462_v52 = vmul.f32 %v447_v49, %v2007_v13 }
 0x12a   : > { %v470_v56 = vadd.f32 1e-05, %v462_v52 }
 0x12c   : > { %1529 = vrsqrt.f32 %v470_v56  ;;  %vm484_vm2 = vweird.f32 %v470_v56 }
 0x12e   : > { %v453_v63 = vpop.xlane.xlu2 %452 }
 0x12f   : > { %v465_v0 = vmul.f32 %v453_v63, %v2007_v13  ;;  %v449_v1 = vpop.xlane.xlu1 %448  ;;  %v414_v2 = vpop.xlane.xlu0 %413 }
 0x130   : > { %v463_v3 = vmul.f32 %v449_v1, %v2007_v13  ;;  %v429_v4 = vmul.f32 %v2007_v13, %v414_v2 }
 0x131   : > { %v473_v5 = vadd.f32 1e-05, %v465_v0 }
 0x132   : > { %v1530_v6 = vpop.eup %1529  ;;  %v471_v7 = vadd.f32 1e-05, %v463_v3  ;;  %v2053_v8 = vsub.f32 %v2025_v30, %v429_v4 }
 0x133   : > { %v479_v9 = vmul.f32 %v1530_v6, %v470_v56  ;;  %1531 = vrsqrt.f32 %v473_v5  ;;  %vm485_vm1 = vweird.f32 %v1530_v6  ;;  %vm514_vm6 = vweird.f32 %v473_v5 }
 0x134   : > { %1533 = vrsqrt.f32 %v471_v7  ;;  %v445_v10 = vmul.f32 %v2053_v8, %v2053_v8  ;;  %vm486_vm3 = vmor %vm484_vm2, %vm485_vm1  ;;  %vm494_vm4 = vweird.f32 %v471_v7 }
 0x135   : > { %v480_v11 = vmul.f32 %v1530_v6, %v479_v9 }
 0x136   : > { %460 = vadd.xlane.f32.xlu0 %v445_v10 }
 0x137   : > { %v481_v12 = vmul.f32 0.5, %v480_v11  ;;  %v451_v14 = vpop.xlane.xlu1 %450  ;;  %v455_v15 = vpop.xlane.xlu0 %454 }
 0x138   : > { %v464_v16 = vmul.f32 %v451_v14, %v2007_v13  ;;  %v466_v17 = vmul.f32 %v455_v15, %v2007_v13 }
 0x139   : > { %v1532_v19 = vpop.eup %1531  ;;  %v482_v20 = vsub.f32 1.5, %v481_v12 }
 0x13a   : > { %v1534_v21 = vpop.eup %1533  ;;  %v509_v30 = vmul.f32 %v1532_v19, %v473_v5  ;;  %v472_v22 = vadd.f32 1e-05, %v464_v16  ;;  %v2059_v23 = vadd.f32 1e-05, %v466_v17  ;;  %vm515_vm7 = vweird.f32 %v1532_v19 }
 0x13b   : > { %v483_v24 = vmul.f32 %v1530_v6, %v482_v20  ;;  %v489_v26 = vmul.f32 %v1534_v21, %v471_v7  ;;  %vm495_vm5 = vweird.f32 %v1534_v21  ;;  %vm516_vm9 = vmor %vm514_vm6, %vm515_vm7 }
 0x13c   : > { %v510_v27 = vmul.f32 %v1532_v19, %v509_v30  ;;  %1535 = vrsqrt.f32 %v472_v22  ;;  %vm496_vm8 = vmor %vm494_vm4, %vm495_vm5  ;;  %vm504_vm10 = vweird.f32 %v472_v22  ;;  %vm524_vm15 = vweird.f32 %v2059_v23 }
 0x13d   : > { %v490_v29 = vmul.f32 %v1534_v21, %v489_v26  ;;  %1537 = vrsqrt.f32 %v2059_v23  ;;  %v487_v34 = vsel %vm486_vm3, %v1530_v6, %v483_v24  ;;  %v459_v26 = vpop.xlane.xlu2 %458 }
 0x13e   : > { %v511_v31 = vmul.f32 0.5, %v510_v27  ;;  %v558_v43 = vmul.f32 %v487_v34, %v2010_v18  ;;  %v468_v27 = vmul.f32 %v459_v26, %v2007_v13 }
 0x13f   : > { %v491_v35 = vmul.f32 0.5, %v490_v29  ;;  %v457_v37 = vpop.xlane.xlu1 %456 }
 0x140   : > { %v512_v38 = vsub.f32 1.5, %v511_v31  ;;  %v467_v39 = vmul.f32 %v457_v37, %v2007_v13  ;;  %v569_v54 = vmul.f32 %v2064_v45, %v558_v43 }
 0x141   : > { %v492_v40 = vsub.f32 1.5, %v491_v35 }
 0x142   : > { %v1536_v42 = vpop.eup %1535  ;;  %v475_v44 = vadd.f32 1e-05, %v467_v39  ;;  %v513_v47 = vmul.f32 %v1532_v19, %v512_v38  ;;  %v580_v0 = vadd.f32 %v2069_v57, %v569_v54 }
 0x143   : > { %v1538_v46 = vpop.eup %1537  ;;  %v493_v48 = vmul.f32 %v1534_v21, %v492_v40  ;;  %v499_v49 = vmul.f32 %v1536_v42, %v472_v22  ;;  %vm505_vm11 = vweird.f32 %v1536_v42 }
 0x144   : > { %v519_v50 = vmul.f32 %v1538_v46, %v2059_v23  ;;  %1539 = vrsqrt.f32 %v475_v44  ;;  %v517_v18 = vsel %vm516_vm9, %v1532_v19, %v513_v47  ;;  %vm506_vm12 = vmor %vm504_vm10, %vm505_vm11  ;;  %vm534_vm13 = vweird.f32 %v475_v44 }
 0x145   : > { %v497_v51 = vsel %vm496_vm8, %v1534_v21, %v493_v48  ;;  %v500_v52 = vmul.f32 %v1536_v42, %v499_v49  ;;  %v561_v60 = vmul.f32 %v517_v18, %v2016_v25  ;;  %vm525_vm0 = vweird.f32 %v1538_v46 }
 0x146   : > { %v559_v53 = vmul.f32 %v497_v51, %v2020_v28  ;;  %v520_v56 = vmul.f32 %v1538_v46, %v519_v50  ;;  %vm526_vm2 = vmor %vm524_vm15, %vm525_vm0 }
 0x147   : > { %v501_v55 = vmul.f32 0.5, %v500_v52  ;;  %v572_v6 = vmul.f32 %v2064_v45, %v561_v60 }
 0x148   : > { %v570_v58 = vmul.f32 %v2064_v45, %v559_v53  ;;  %v521_v28 = vmul.f32 0.5, %v520_v56 }
 0x149   : > { %v502_v59 = vsub.f32 1.5, %v501_v55 }
 0x14a   : > { %v581_v61 = vadd.f32 %v2069_v57, %v570_v58  ;;  %v1540_v62 = vpop.eup %1539  ;;  %v522_v7 = vsub.f32 1.5, %v521_v28  ;;  %v2098_v58 = vld [vmem:[%s2264_s4] ss:$0 sm:$0xff] }
 0x14b   : > { %v503_v63 = vmul.f32 %v1536_v42, %v502_v59  ;;  %v529_v1 = vmul.f32 %v1540_v62, %v475_v44  ;;  %vm535_vm14 = vweird.f32 %v1540_v62 }
 0x14c   : > { %v588_v3 = vpack.c.bf16 %v581_v61, %v580_v0  ;;  %v523_v12 = vmul.f32 %v1538_v46, %v522_v7  ;;  %vm536_vm1 = vmor %vm534_vm13, %vm535_vm14 }
 0x14d   : > { %v507_v2 = vsel %vm506_vm12, %v1536_v42, %v503_v63  ;;  %v530_v5 = vmul.f32 %v1540_v62, %v529_v1  ;;  %v2113_v1 = vld [vmem:[%s2264_s4 + $0x2] ss:$0 sm:$0xff] }
 0x14e   : > { %v560_v4 = vmul.f32 %v507_v2, %v2031_v33  ;;  %668 = vmatmul.bf16.vlgmr.msra.gmra.mxu0 %v588_v3  ;;  %781 = vmatmul.bf16.vlgmr.msra.gmra.mxu1 %v588_v3  ;;  %v583_v33 = vadd.f32 %v2069_v57, %v572_v6  ;;  %v527_v17 = vsel %vm526_vm2, %v1538_v46, %v523_v12 }
 0x14f   : > { %v531_v25 = vmul.f32 0.5, %v530_v5  ;;  %894 = vmatmul.bf16.vlgmr.msra.gmra.mxu2 %v588_v3  ;;  %v562_v20 = vmul.f32 %v527_v17, %v2029_v32 }
 0x150   : > { %v571_v9 = vmul.f32 %v2064_v45, %v560_v4 }
 0x151   : > { %v532_v10 = vsub.f32 1.5, %v531_v25  ;;  %v573_v30 = vmul.f32 %v2064_v45, %v562_v20 }
 0x152   : > { %v582_v11 = vadd.f32 %v2069_v57, %v571_v9 }
 0x153   : > { %v533_v14 = vmul.f32 %v1540_v62, %v532_v10  ;;  %v584_v23 = vadd.f32 %v2069_v57, %v573_v30 }
 0x154   : > { %v589_v15 = vpack.c.bf16 %v583_v33, %v582_v11 }
 0x155   : > { %v537_v16 = vsel %vm536_vm1, %v1540_v62, %v533_v14 }
 0x156   : > { %673 = vmatmul.bf16.vlgmr.msra.gmra.mxu3 %v589_v15  ;;  %v563_v19 = vmul.f32 %v537_v16, %v2044_v41  ;;  %v476_v41 = vadd.f32 1e-05, %v468_v27 }
 0x158   : > { %v574_v21 = vmul.f32 %v2064_v45, %v563_v19  ;;  %1541 = vrsqrt.f32 %v476_v41  ;;  %vm544_vm3 = vweird.f32 %v476_v41 }
 0x15a   : > { %v585_v22 = vadd.f32 %v2069_v57, %v574_v21 }
 0x15c   : > { %v590_v24 = vpack.c.bf16 %v585_v22, %v584_v23 }
 0x15e   : > { %786 = vmatmul.bf16.gmra.mxu1 %v589_v15  ;;  %v1542_v32 = vpop.eup %1541 }
 0x15f   : > { %899 = vmatmul.bf16.gmra.mxu2 %v589_v15  ;;  %v539_v29 = vmul.f32 %v1542_v32, %v476_v41  ;;  %vm545_vm4 = vweird.f32 %v1542_v32 }
 0x160   : > { %vm546_vm5 = vmor %vm544_vm3, %vm545_vm4 }
 0x161   : > { %v540_v31 = vmul.f32 %v1542_v32, %v539_v29 }
 0x163   : > { %v541_v38 = vmul.f32 0.5, %v540_v31 }
 0x165   : > { %v542_v39 = vsub.f32 1.5, %v541_v38 }
 0x166   : > { %678 = vmatmul.bf16.gmra.mxu3 %v590_v24 }
 0x167   : > { %v543_v42 = vmul.f32 %v1542_v32, %v542_v39 }
 0x169   : > { %v547_v46 = vsel %vm546_vm5, %v1542_v32, %v543_v42 }
 0x16a   : > { %v564_v49 = vmul.f32 %v547_v46, %v2035_v36 }
 0x16c   : > { %v575_v52 = vmul.f32 %v2064_v45, %v564_v49 }
 0x16e   : > { %791 = vmatmul.bf16.gmra.mxu1 %v590_v24  ;;  %v586_v54 = vadd.f32 %v2069_v57, %v575_v52 }
 0x16f   : > { %904 = vmatmul.bf16.gmra.mxu2 %v590_v24 }
 0x1a9   : > { %v461_v34 = vpop.xlane.xlu0 %460 }
 0x1aa   : > { %v469_v35 = vmul.f32 %v461_v34, %v2007_v13 }
 0x1ac   : > { %v477_v37 = vadd.f32 1e-05, %v469_v35 }
 0x1ae   : > { %1543 = vrsqrt.f32 %v477_v37  ;;  %vm554_vm7 = vweird.f32 %v477_v37 }
 0x1b4   : > { %v1544_v40 = vpop.eup %1543 }
 0x1b5   : > { %v549_v43 = vmul.f32 %v1544_v40, %v477_v37  ;;  %vm555_vm6 = vweird.f32 %v1544_v40 }
 0x1b6   : > { %vm556_vm8 = vmor %vm554_vm7, %vm555_vm6 }
 0x1b7   : > { %v550_v44 = vmul.f32 %v1544_v40, %v549_v43 }
 0x1b9   : > { %v551_v47 = vmul.f32 0.5, %v550_v44 }
 0x1bb   : > { %v552_v48 = vsub.f32 1.5, %v551_v47 }
 0x1bd   : > { %v553_v50 = vmul.f32 %v1544_v40, %v552_v48 }
 0x1bf   : > { %v557_v13 = vsel %vm556_vm8, %v1544_v40, %v553_v50 }
 0x1c0   : > { %v565_v51 = vmul.f32 %v557_v13, %v2053_v8  ;;  %v2103_v8 = vld [vmem:[%s2264_s4 + $0x1] ss:$0 sm:$0xff] }
 0x1c2   : > { %v576_v53 = vmul.f32 %v2064_v45, %v565_v51 }
 0x1c4   : > { %v587_v18 = vadd.f32 %v2069_v57, %v576_v53 }
 0x1c6   : > { %v591_v55 = vpack.c.bf16 %v587_v18, %v586_v54 }
 0x1c8   : > { %683 = vmatmul.bf16.gmra.mxu3 %v591_v55  ;;  %796 = vmatmul.bf16.gmra.mxu1 %v591_v55 }
 0x1c9   : > { %909 = vmatmul.bf16.gmra.mxu2 %v591_v55 }
 0x1cb   : > { %v669_v36 = vpop.f32.mrf.mxu0  ;;  %v782_v56 = vpop.f32.mrf.mxu1 }
 0x1cc   : > { %v670_v60 = vadd.f32 %v2098_v58, %v669_v36  ;;  %v783_v61 = vadd.f32 %v2103_v8, %v782_v56 }
 0x1d2   : > { %v895_v45 = vpop.f32.mrf.mxu2 }
 0x1d3   : > { %v671_v59 = vpop.f32.mrf.mxu0  ;;  %v784_v57 = vpop.f32.mrf.mxu1  ;;  %v896_v4 = vadd.f32 %v2113_v1, %v895_v45 }
 0x1d4   : > { %v672_v62 = vadd.f32 %v2098_v58, %v671_v59  ;;  %v785_v63 = vadd.f32 %v2103_v8, %v784_v57 }
 0x1d6   : > { %v1338_v28 = vpack.c.bf16 %v672_v62, %v670_v60  ;;  %v1358_v0 = vpack.c.bf16 %v785_v63, %v783_v61 }
 0x1d8   : > { %1339 = vst [vmem:[%s2115_s16] sm:$0xff] %v1338_v28  }
 0x1d9   : > { %v674_v2 = vpop.f32.mrf.mxu3  ;;  %1359 = vst [vmem:[%s2118_s19] sm:$0xff] %v1358_v0  }
 0x1da   : > { %v897_v3 = vpop.f32.mrf.mxu2  ;;  %v675_v9 = vadd.f32 %v2098_v58, %v674_v2 }
 0x1db   : > { %v898_v5 = vadd.f32 %v2113_v1, %v897_v3  ;;  %v787_v6 = vpop.f32.mrf.mxu1 }
 0x1dc   : > { %v788_v14 = vadd.f32 %v2103_v8, %v787_v6 }
 0x1dd   : > { %v1378_v7 = vpack.c.bf16 %v898_v5, %v896_v4 }
 0x1df   : > { %1379 = vst [vmem:[%s2123_s12] sm:$0xff] %v1378_v7  }
 0x1e1   : > { %v676_v25 = vpop.f32.mrf.mxu3 }
 0x1e2   : > { %v677_v10 = vadd.f32 %v2098_v58, %v676_v25  ;;  %v900_v11 = vpop.f32.mrf.mxu2 }
 0x1e3   : > { %v789_v12 = vpop.f32.mrf.mxu1  ;;  %v901_v20 = vadd.f32 %v2113_v1, %v900_v11 }
 0x1e4   : > { %v1343_v33 = vpack.c.bf16 %v677_v10, %v675_v9  ;;  %v790_v15 = vadd.f32 %v2103_v8, %v789_v12 }
 0x1e6   : > { %1395 = vst [vmem:[%s2115_s16 + $0x8] sm:$0xff] %v1343_v33   ;;  %v1363_v16 = vpack.c.bf16 %v790_v15, %v788_v14 }
 0x1e8   : > { %1398 = vst [vmem:[%s2118_s19 + $0x8] sm:$0xff] %v1363_v16  }
 0x1e9   : > { %v679_v17 = vpop.f32.mrf.mxu3 }
 0x1ea   : > { %v902_v19 = vpop.f32.mrf.mxu2  ;;  %v680_v24 = vadd.f32 %v2098_v58, %v679_v17 }
 0x1eb   : > { %v903_v21 = vadd.f32 %v2113_v1, %v902_v19  ;;  %v792_v30 = vpop.f32.mrf.mxu1 }
 0x1ec   : > { %v793_v29 = vadd.f32 %v2103_v8, %v792_v30 }
 0x1ed   : > { %v1383_v22 = vpack.c.bf16 %v903_v21, %v901_v20 }
 0x1ef   : > { %1401 = vst [vmem:[%s2123_s12 + $0x8] sm:$0xff] %v1383_v22  }
 0x1f1   : > { %v681_v23 = vpop.f32.mrf.mxu3 }
 0x1f2   : > { %v682_v26 = vadd.f32 %v2098_v58, %v681_v23  ;;  %v905_v27 = vpop.f32.mrf.mxu2 }
 0x1f3   : > { %v794_v32 = vpop.f32.mrf.mxu1  ;;  %v906_v37 = vadd.f32 %v2113_v1, %v905_v27 }
 0x1f4   : > { %v1348_v41 = vpack.c.bf16 %v682_v26, %v680_v24  ;;  %v795_v31 = vadd.f32 %v2103_v8, %v794_v32 }
 0x1f6   : > { %1396 = vst [vmem:[%s2115_s16 + $0x10] sm:$0xff] %v1348_v41   ;;  %v1368_v34 = vpack.c.bf16 %v795_v31, %v793_v29 }
 0x1f8   : > { %1399 = vst [vmem:[%s2118_s19 + $0x10] sm:$0xff] %v1368_v34  }
 0x1fa   : > { %v907_v35 = vpop.f32.mrf.mxu2 }
 0x1fb   : > { %v908_v38 = vadd.f32 %v2113_v1, %v907_v35 }
 0x1fd   : > { %v1388_v39 = vpack.c.bf16 %v908_v38, %v906_v37 }
 0x1ff   : > { %1402 = vst [vmem:[%s2123_s12 + $0x10] sm:$0xff] %v1388_v39  }
 0x245   : > { %v797_v40 = vpop.f32.mrf.mxu1 }
 0x246   : > { %v798_v46 = vadd.f32 %v2103_v8, %v797_v40 }
 0x24b   : > { %v684_v42 = vpop.f32.mrf.mxu3 }
 0x24c   : > { %v910_v43 = vpop.f32.mrf.mxu2 }
 0x24d   : > { %v799_v44 = vpop.f32.mrf.mxu1 }
 0x24e   : > { %v800_v47 = vadd.f32 %v2103_v8, %v799_v44 }
 0x250   : > { %v1373_v48 = vpack.c.bf16 %v800_v47, %v798_v46 }
 0x252   : > { %1400 = vst [vmem:[%s2118_s19 + $0x18] sm:$0xff] %v1373_v48  }
 0x253   : > { %v686_v49 = vpop.f32.mrf.mxu3 }
 0x254   : > { %1692 = shalt.err (!%p1689_p0)
}
 0x255   : > { %s1825_s17 = smov 64   ;;  %s1826_s23 = smov 4   ;;  %v685_v50 = vadd.f32 %v2098_v58, %v684_v42  ;;  %v687_v13 = vadd.f32 %v2098_v58, %v686_v49  ;;  %v912_v51 = vpop.f32.mrf.mxu2  ;;  %v911_v52 = vadd.f32 %v2113_v1, %v910_v43 }
 0x256   : > { %1427 = dma.vmem_to_hbm [thread:$0]  (%p1954_p3), %s2155_s20, 512, %s978_s1, %s2170_s11, %s1825_s17, %s1825_s17, %s1826_s23   ;;  %v913_v53 = vadd.f32 %v2113_v1, %v912_v51 }
 0x257   : > { %s2189_s0 = sshll.u32 %s955_s3, 4  ;;  %s994_s30 = sshll.u32 %s2123_s12, 4  ;;  %v1353_v54 = vpack.c.bf16 %v687_v13, %v685_v50  ;;  %s959_s0 = int_to_ptr.hbm [resolvable:$true] %s2189_s0  ;;  %s2197_s30 = int_to_ptr.vmem [resolvable:$true] %s994_s30 }
 0x258   : > { %s2194_s10 = sshll.u32 %s993_s14, 4  ;;  %v1393_v18 = vpack.c.bf16 %v913_v53, %v911_v52  ;;  %s932_s20 = scalar_lea.sflag [#allocation4], %s1982_s22  ;;  %s997_s10 = int_to_ptr.hbm [resolvable:$true] %s2194_s10 }
 0x259   : > { %1397 = vst [vmem:[%s2115_s16 + $0x18] sm:$0xff] %v1353_v54   ;;  %s1707_s1 = sshra.s32 %s959_s0, 4  ;;  %s1713_s21 = scalar_lea.hbm %s2265_s5, 64  ;;  %s1708_s1 = int_to_ptr.hbm [resolvable:$true] %s1707_s1 }
 0x25a   : > { %1403 = vst [vmem:[%s2123_s12 + $0x18] sm:$0xff] %v1393_v18   ;;  %s1709_s3 = scalar_lea.hbm %s1708_s1, 32  ;;  %p1714_p2 = scmp.lt.s32.totalorder %s1708_s1, %s2265_s5 }
 0x25b   : > { %p1710_p5 = scmp.ne.s32.totalorder %s1708_s1, %s1709_s3  ;;  %p1715_p1 = scmp.lt.s32.totalorder %s1713_s21, %s1709_s3 }
 0x25d   : > { %p1711_p7 = pnand %p1710_p5, %p1954_p3  ;;  %p1716_p4 = por %p1715_p1, %p1714_p2 }
 0x25f   : > { %p1712_p10 = pneg %p1711_p7 }
 0x261   : > { %p1717_p8 = pnand %p1716_p4, %p1712_p10 }
 0x263   : > { %1720 = shalt.err (!%p1717_p8)
}
 0x264   : > { %1426 = dma.vmem_to_hbm [thread:$0]  (%p1954_p3), %s957_s9, 512, %s959_s0, %s932_s20, %s1825_s17, %s1825_s17, %s1826_s23  }
 0x265   : > { %s1735_s22 = sshra.s32 %s997_s10, 4  ;;  %s1741_s19 = scalar_lea.hbm %s2267_s7, 64  ;;  %s1736_s22 = int_to_ptr.hbm [resolvable:$true] %s1735_s22 }
 0x266   : > { %s1737_s16 = scalar_lea.hbm %s1736_s22, 32  ;;  %p1742_p0 = scmp.lt.s32.totalorder %s1736_s22, %s2267_s7 }
 0x267   : > { %p1738_p11 = scmp.ne.s32.totalorder %s1736_s22, %s1737_s16  ;;  %p1743_p5 = scmp.lt.s32.totalorder %s1741_s19, %s1737_s16 }
 0x269   : > { %p1739_p12 = pnand %p1738_p11, %p1954_p3  ;;  %p1744_p7 = por %p1743_p5, %p1742_p0 }
 0x26b   : > { %p1740_p13 = pneg %p1739_p12 }
 0x26d   : > { %p1745_p10 = pnand %p1744_p7, %p1740_p13 }
 0x26f   : > { %1748 = shalt.err (!%p1745_p10)
}
 0x270   : > { %1428 = dma.vmem_to_hbm [thread:$0]  (%p1954_p3), %s2197_s30, 512, %s997_s10, %s2170_s11, %s1825_s17, %s1825_s17, %s1826_s23  }
 0x271 PF: > { %s1011_s0 = sand.u32 1, %s1795_s24   ;;  %p1447_p2 = pnand %p1188_p9, %p1914_p6 }
 0x272   : > { %s1012_s20 = scalar_lea.sflag [#allocation4], %s1011_s0 }
 0x273   : > { %p1448_p1 = pneg %p1447_p2 }
 0x275   : > { %1786 = dma.done.wait (%p1448_p1), %s1012_s20, 512  }
 0x276   : > { %1788 = vsyncadd (%p1448_p1), %s1012_s20, 4294966784  ;;  %s2288_s13 = sadd.s32 4294967294, %s1815_s29  }
 0x277   : > { %s1021_s14 = sand.u32 1, %s2288_s13  }
 0x278   : > { %s1022_s18 = scalar_lea.sflag [#allocation12], %s1021_s14 }
 0x279   : > { %1790 = dma.done.wait (%p1448_p1), %s1022_s18, 1024  }
 0x27a   : > { %1792 = vsyncadd (%p1448_p1), %s1022_s18, 4294966272  ;;  %s29_s29 = sadd.s32 1, %s1815_s29   ;;  %s2289_s11 = sld [smem:[#allocation20_spill]] }
 0x27b   : > { %p26_p3 = scmp.ge.s32.totalorder %s29_s29, 4   ;;  %s2290_s24 = smov %s1799_s25 }
 0x27c   : > { %s2291_s25 = smov %s1803_s26  ;;  %s2292_s26 = smov %s1970_s15 }
 0x27d   : > { %s2293_s27 = smov %s1811_s28  ;;  %28 = sbr.rel (!%p26_p3) target bundleno = 15 (0xf), region = 129 }
 0x280   : > { %s2294_s28 = smov %s2289_s11 }
 0x282   :  { %1038 = vsyncpa [#allocation3], 1 }
 0x283   :  { %1040 = vsyncpa [#allocation3 + $0x1], 1 }
 0x284   :  { %1041 = vsyncpa [#allocation6], 1 }
 0x285   :  { %1042 = vsyncpa [#allocation9], 1 }
 0x286   :  { %1043 = vsyncpa [#allocation4], 1 }
 0x287   :  { %1045 = vsyncpa [#allocation4 + $0x1], 1 }
 0x288   :  { %1046 = vsyncpa [#allocation12], 1 }
 0x289   :  { %1048 = vsyncpa [#allocation12 + $0x1], 1 }

</bundles_post_ra>
